<compile_context>
chip_gen: v7x
topology: tpu7x:2x2x1
jax: 0.10.0
libtpu: 0.0.40
codegen_flags: <defaults>
</compile_context>

<pallas_src>
import jax
import jax.numpy as jnp
from jax.experimental import pallas as pl
from jax.experimental.pallas import tpu as pltpu

# ----------------------------- dimensions ----------------------------------
B = 8                       # batch (number of graphs)
RNA_IN = 40                 # rna_input_dim
RNA_OUT = 32                # rna_output_dim
KMER_IN = 64                # rna_kmer_input_dim
KMER_OUT = 32               # rna_kmer_output_dim
SVD_DIM = 16                # rna_svd_dim
PROT_IN = 24                # protein_input_dim (node feature dim)
PROT_OUT = 48               # protein_output_dim
FINAL_HID = 32              # final_hidden_dim
H1 = FINAL_HID * 2          # 64
COMBINED = RNA_OUT + KMER_OUT + SVD_DIM + PROT_OUT   # 128
NODES_PER_GRAPH = 4
N_NODES = B * NODES_PER_GRAPH
LN_EPS = 1e-5

# weight-slab row offsets (all multiples of 8)
_R_RNA = 0                        # rna_w      (40, 32)
_R_KMER = _R_RNA + RNA_IN         # 40   kmer_w (64, 32)
_R_PROT = _R_KMER + KMER_IN       # 104  prot_w (24, 48)
_R_W1A = _R_PROT + PROT_IN        # 128  W1[  0: 32] (32, 64)  rna block
_R_W1B = _R_W1A + RNA_OUT         # 160  W1[ 32: 64] (32, 64)  kmer block
_R_W1C = _R_W1B + KMER_OUT        # 192  W1[ 64: 80] (16, 64)  svd block
_R_W1D = _R_W1C + SVD_DIM         # 208  W1[ 80:128] (48, 64)  protein block
_R_W2 = _R_W1D + PROT_OUT         # 256  W2 (64, 32)
_W_ROWS = _R_W2 + H1              # 320
_V_ROWS = 16                      # vector slab rows (11 used, padded to 16)


# ----------------------------- Pallas kernel --------------------------------
def _layernorm(x, gamma, beta):
    mean = jnp.mean(x, axis=-1, keepdims=True)
    centered = x - mean
    var = jnp.mean(centered * centered, axis=-1, keepdims=True)
    inv = jax.lax.rsqrt(var + LN_EPS)
    return centered * inv * gamma + beta


def fused_kernel(rna_ref, kmer_ref, svd_ref, px_ref, pool_ref,
                 w_ref, v_ref, out_ref):
    f32 = jnp.float32

    # --- stand-in feature extractors (linear + ReLU) -------------------------
    # TODO(synk): RNAFeatureExtractor / RNAFeatureExtractorKmer /
    # ProteinFeatureExtractor definitions were not provided; deterministic
    # linear (+ mean-pool for protein) stand-ins are fused here instead.
    rna_act = jnp.maximum(
        jnp.dot(rna_ref[...], w_ref[_R_RNA:_R_KMER, 0:RNA_OUT],
                preferred_element_type=f32) + v_ref[0:1, 0:RNA_OUT], 0.0)

    kmer_act = jnp.maximum(
        jnp.dot(kmer_ref[...], w_ref[_R_KMER:_R_PROT, 0:KMER_OUT],
                preferred_element_type=f32) + v_ref[1:2, 0:KMER_OUT], 0.0)

    pooled = jnp.dot(pool_ref[...], px_ref[...], preferred_element_type=f32)
    prot_act = jnp.maximum(
        jnp.dot(pooled, w_ref[_R_PROT:_R_W1A, 0:PROT_OUT],
                preferred_element_type=f32) + v_ref[2:3, 0:PROT_OUT], 0.0)

    svd = svd_ref[...]

    # --- fc1: concat folded into W1 row-block partial matmuls ---------------
    h1 = (jnp.dot(rna_act,  w_ref[_R_W1A:_R_W1B, 0:H1], preferred_element_type=f32)
          + jnp.dot(kmer_act, w_ref[_R_W1B:_R_W1C, 0:H1], preferred_element_type=f32)
          + jnp.dot(svd,      w_ref[_R_W1C:_R_W1D, 0:H1], preferred_element_type=f32)
          + jnp.dot(prot_act, w_ref[_R_W1D:_R_W2, 0:H1], preferred_element_type=f32)
          + v_ref[3:4, 0:H1])
    h1 = _layernorm(h1, v_ref[4:5, 0:H1], v_ref[5:6, 0:H1])
    h1 = jnp.maximum(h1, 0.0)

    # --- fc2 -> ln2 -> relu ---------------------------------------------------
    h2 = (jnp.dot(h1, w_ref[_R_W2:_W_ROWS, 0:FINAL_HID], preferred_element_type=f32)
          + v_ref[6:7, 0:FINAL_HID])
    h2 = _layernorm(h2, v_ref[7:8, 0:FINAL_HID], v_ref[8:9, 0:FINAL_HID])
    h2 = jnp.maximum(h2, 0.0)

    # --- fc3 as VPU multiply + lane reduce (K=32, N=1 matmul wastes the MXU) --
    z = (jnp.sum(h2 * v_ref[9:10, 0:FINAL_HID], axis=-1, keepdims=True)
         + v_ref[10:11, 0:1])
    p = jax.nn.sigmoid(z)                                   # (B, 1)

    # lane-dense, unmasked store; wrapper slices [:, :1]
    out_ref[...] = jnp.broadcast_to(p, out_ref.shape)


def forward(rna_features, rna_kmer, rna_svd, protein_x, protein_batch_idx,
            w_slab, v_slab):
    """Full fused forward. Returns (B, 1) probabilities."""
    # Dense pool matrix instead of segment_sum (no XLA scatter launch).
    onehot = (protein_batch_idx[None, :] ==
              jnp.arange(B, dtype=protein_batch_idx.dtype)[:, None]
              ).astype(jnp.float32)                          # (B, N_NODES)
    counts = jnp.maximum(jnp.sum(onehot, axis=1, keepdims=True), 1.0)
    pool = onehot / counts

    vmem = pltpu.MemorySpace.VMEM
    out = pl.pallas_call(
        fused_kernel,
        out_shape=jax.ShapeDtypeStruct((B, 128), jnp.float32),
        in_specs=[pl.BlockSpec(memory_space=vmem)] * 7,
        out_specs=pl.BlockSpec(memory_space=vmem),
    )(rna_features, rna_kmer, rna_svd, protein_x, pool, w_slab, v_slab)
    return out[:, :1]


# -------------------------- parameter construction --------------------------
def _linear_init(key, fan_in, fan_out):
    kw, kb = jax.random.split(key)
    bound = 1.0 / jnp.sqrt(fan_in)
    w = jax.random.uniform(kw, (fan_in, fan_out), jnp.float32, -bound, bound)
    b = jax.random.uniform(kb, (1, fan_out), jnp.float32, -bound, bound)
    return w, b


def make_params(key):
    keys = jax.random.split(key, 8)
    # head
    w1, b1 = _linear_init(keys[0], COMBINED, H1)
    g1 = jnp.ones((1, H1), jnp.float32)
    be1 = jnp.zeros((1, H1), jnp.float32)
    w2, b2 = _linear_init(keys[1], H1, FINAL_HID)
    g2 = jnp.ones((1, FINAL_HID), jnp.float32)
    be2 = jnp.zeros((1, FINAL_HID), jnp.float32)
    w3, b3 = _linear_init(keys[2], FINAL_HID, 1)
    # stand-in extractor weights
    rna_w, rna_b = _linear_init(keys[3], RNA_IN, RNA_OUT)
    kmer_w, kmer_b = _linear_init(keys[4], KMER_IN, KMER_OUT)
    prot_w, prot_b = _linear_init(keys[5], PROT_IN, PROT_OUT)

    raw = (rna_w, rna_b, kmer_w, kmer_b, prot_w, prot_b,
           w1, b1, g1, be1, w2, b2, g2, be2, w3, b3)

    # --- pack matrices into one (320, 128) slab ------------------------------
    W = jnp.zeros((_W_ROWS, 128), jnp.float32)
    W = W.at[_R_RNA:_R_KMER, 0:RNA_OUT].set(rna_w)
    W = W.at[_R_KMER:_R_PROT, 0:KMER_OUT].set(kmer_w)
    W = W.at[_R_PROT:_R_W1A, 0:PROT_OUT].set(prot_w)
    W = W.at[_R_W1A:_R_W1B, 0:H1].set(w1[0:RNA_OUT])
    W = W.at[_R_W1B:_R_W1C, 0:H1].set(w1[RNA_OUT:RNA_OUT + KMER_OUT])
    W = W.at[_R_W1C:_R_W1D, 0:H1].set(w1[RNA_OUT + KMER_OUT:
                                         RNA_OUT + KMER_OUT + SVD_DIM])
    W = W.at[_R_W1D:_R_W2, 0:H1].set(w1[RNA_OUT + KMER_OUT + SVD_DIM:])
    W = W.at[_R_W2:_W_ROWS, 0:FINAL_HID].set(w2)

    # --- pack vectors into one (16, 128) slab --------------------------------
    V = jnp.zeros((_V_ROWS, 128), jnp.float32)
    V = V.at[0, 0:RNA_OUT].set(rna_b[0])
    V = V.at[1, 0:KMER_OUT].set(kmer_b[0])
    V = V.at[2, 0:PROT_OUT].set(prot_b[0])
    V = V.at[3, 0:H1].set(b1[0])
    V = V.at[4, 0:H1].set(g1[0])
    V = V.at[5, 0:H1].set(be1[0])
    V = V.at[6, 0:FINAL_HID].set(b2[0])
    V = V.at[7, 0:FINAL_HID].set(g2[0])
    V = V.at[8, 0:FINAL_HID].set(be2[0])
    V = V.at[9, 0:FINAL_HID].set(w3[:, 0])
    V = V.at[10, 0].set(b3[0, 0])

    return W, V, raw


# ------------------------- pure-JAX reference (check) ------------------------
def reference(rna_features, rna_kmer, rna_svd, protein_x, batch_idx, raw):
    (rna_w, rna_b, kmer_w, kmer_b, prot_w, prot_b,
     w1, b1, g1, be1, w2, b2, g2, be2, w3, b3) = raw

    def ln(x, g, b):
        m = x.mean(-1, keepdims=True)
        v = ((x - m) ** 2).mean(-1, keepdims=True)
        return (x - m) * jax.lax.rsqrt(v + LN_EPS) * g + b

    rna_vec = jax.nn.relu(rna_features @ rna_w + rna_b)
    kmer_vec = jax.nn.relu(rna_kmer @ kmer_w + kmer_b)
    onehot = (batch_idx[None, :] ==
              jnp.arange(B, dtype=batch_idx.dtype)[:, None]).astype(jnp.float32)
    pooled = (onehot @ protein_x) / jnp.maximum(onehot.sum(1, keepdims=True), 1.0)
    prot_vec = jax.nn.relu(pooled @ prot_w + prot_b)
    combined = jnp.concatenate([rna_vec, kmer_vec, rna_svd, prot_vec], axis=1)
    h = jax.nn.relu(ln(combined @ w1 + b1, g1, be1))
    h = jax.nn.relu(ln(h @ w2 + b2, g2, be2))
    return jax.nn.sigmoid(h @ w3 + b3)


# ------------------------------- main ----------------------------------------
if __name__ == "__main__":
    key = jax.random.PRNGKey(0)
    k_in, k_param = jax.random.split(key)
    k1, k2, k3, k4 = jax.random.split(k_in, 4)

    rna_features = jax.random.normal(k1, (B, RNA_IN), jnp.float32)
    rna_kmer = jax.random.normal(k2, (B, KMER_IN), jnp.float32)
    rna_svd = jax.random.normal(k3, (B, SVD_DIM), jnp.float32)
    protein_x = jax.random.normal(k4, (N_NODES, PROT_IN), jnp.float32)
    protein_batch_idx = jnp.repeat(
        jnp.arange(B, dtype=jnp.int32), NODES_PER_GRAPH)

    w_slab, v_slab, raw_params = make_params(k_param)

    fwd = jax.jit(forward)
    out = fwd(rna_features, rna_kmer, rna_svd, protein_x, protein_batch_idx,
              w_slab, v_slab)
    out = jax.block_until_ready(out)

    assert out.shape == (B, 1)
    assert bool(jnp.all((out >= 0.0) & (out <= 1.0)))

    ref = reference(rna_features, rna_kmer, rna_svd, protein_x,
                    protein_batch_idx, raw_params)
    assert bool(jnp.allclose(out, ref, atol=1e-3, rtol=1e-3))

    print("KERNEL_OK")
</pallas_src>

<mosaic_0001>
module attributes {stable_mosaic.version = 11 : i64} {
  func.func @fused_kernel(%arg0: memref<8x40xf32, #tpu.memory_space<vmem>>, %arg1: memref<8x64xf32, #tpu.memory_space<vmem>>, %arg2: memref<8x16xf32, #tpu.memory_space<vmem>>, %arg3: memref<32x24xf32, #tpu.memory_space<vmem>>, %arg4: memref<8x32xf32, #tpu.memory_space<vmem>>, %arg5: memref<320x128xf32, #tpu.memory_space<vmem>>, %arg6: memref<16x128xf32, #tpu.memory_space<vmem>>, %arg7: memref<8x128xf32, #tpu.memory_space<vmem>>) attributes {dimension_semantics = [], scalar_prefetch = 0 : i64, scratch_operands = 0 : i64, tpu.core_type = #tpu.core_type<tc>} {
    %c0 = arith.constant 0 : index
    %c0_0 = arith.constant 0 : index
    %0 = vector.load %arg0[%c0, %c0_0] : memref<8x40xf32, #tpu.memory_space<vmem>>, vector<8x40xf32>
    %c0_1 = arith.constant 0 : index
    %c0_2 = arith.constant 0 : index
    %1 = vector.load %arg5[%c0_1, %c0_2] : memref<320x128xf32, #tpu.memory_space<vmem>>, vector<40x32xf32>
    %cst = arith.constant dense<0.000000e+00> : vector<8x32xf32>
    %2 = tpu.matmul %0, %1, %cst {dimension_numbers = #tpu.dot_dimension_numbers<[1], [0], [0], [1], [0, 0, 1, 1], [], []>} : vector<8x40xf32>, vector<40x32xf32>, vector<8x32xf32> -> vector<8x32xf32>
    %c0_3 = arith.constant 0 : index
    %c0_4 = arith.constant 0 : index
    %3 = vector.load %arg6[%c0_3, %c0_4] : memref<16x128xf32, #tpu.memory_space<vmem>>, vector<1x32xf32>
    %4 = vector.broadcast %3 : vector<1x32xf32> to vector<8x32xf32>
    %5 = arith.addf %2, %4 : vector<8x32xf32>
    %cst_5 = arith.constant 0.000000e+00 : f32
    %6 = vector.broadcast %cst_5 : f32 to vector<8x32xf32>
    %7 = arith.maximumf %5, %6 : vector<8x32xf32>
    %c0_6 = arith.constant 0 : index
    %c0_7 = arith.constant 0 : index
    %8 = vector.load %arg1[%c0_6, %c0_7] : memref<8x64xf32, #tpu.memory_space<vmem>>, vector<8x64xf32>
    %c40 = arith.constant 40 : index
    %c0_8 = arith.constant 0 : index
    %9 = vector.load %arg5[%c40, %c0_8] : memref<320x128xf32, #tpu.memory_space<vmem>>, vector<64x32xf32>
    %cst_9 = arith.constant dense<0.000000e+00> : vector<8x32xf32>
    %10 = tpu.matmul %8, %9, %cst_9 {dimension_numbers = #tpu.dot_dimension_numbers<[1], [0], [0], [1], [0, 0, 1, 1], [], []>} : vector<8x64xf32>, vector<64x32xf32>, vector<8x32xf32> -> vector<8x32xf32>
    %c1 = arith.constant 1 : index
    %c0_10 = arith.constant 0 : index
    %11 = vector.load %arg6[%c1, %c0_10] : memref<16x128xf32, #tpu.memory_space<vmem>>, vector<1x32xf32>
    %12 = vector.broadcast %11 : vector<1x32xf32> to vector<8x32xf32>
    %13 = arith.addf %10, %12 : vector<8x32xf32>
    %cst_11 = arith.constant 0.000000e+00 : f32
    %14 = vector.broadcast %cst_11 : f32 to vector<8x32xf32>
    %15 = arith.maximumf %13, %14 : vector<8x32xf32>
    %c0_12 = arith.constant 0 : index
    %c0_13 = arith.constant 0 : index
    %16 = vector.load %arg4[%c0_12, %c0_13] : memref<8x32xf32, #tpu.memory_space<vmem>>, vector<8x32xf32>
    %c0_14 = arith.constant 0 : index
    %c0_15 = arith.constant 0 : index
    %17 = vector.load %arg3[%c0_14, %c0_15] : memref<32x24xf32, #tpu.memory_space<vmem>>, vector<32x24xf32>
    %cst_16 = arith.constant dense<0.000000e+00> : vector<8x24xf32>
    %18 = tpu.matmul %16, %17, %cst_16 {dimension_numbers = #tpu.dot_dimension_numbers<[1], [0], [0], [1], [0, 0, 1, 1], [], []>} : vector<8x32xf32>, vector<32x24xf32>, vector<8x24xf32> -> vector<8x24xf32>
    %c104 = arith.constant 104 : index
    %c0_17 = arith.constant 0 : index
    %19 = vector.load %arg5[%c104, %c0_17] : memref<320x128xf32, #tpu.memory_space<vmem>>, vector<24x48xf32>
    %cst_18 = arith.constant dense<0.000000e+00> : vector<8x48xf32>
    %20 = tpu.matmul %18, %19, %cst_18 {dimension_numbers = #tpu.dot_dimension_numbers<[1], [0], [0], [1], [0, 0, 1, 1], [], []>} : vector<8x24xf32>, vector<24x48xf32>, vector<8x48xf32> -> vector<8x48xf32>
    %c2 = arith.constant 2 : index
    %c0_19 = arith.constant 0 : index
    %21 = vector.load %arg6[%c2, %c0_19] : memref<16x128xf32, #tpu.memory_space<vmem>>, vector<1x48xf32>
    %22 = vector.broadcast %21 : vector<1x48xf32> to vector<8x48xf32>
    %23 = arith.addf %20, %22 : vector<8x48xf32>
    %cst_20 = arith.constant 0.000000e+00 : f32
    %24 = vector.broadcast %cst_20 : f32 to vector<8x48xf32>
    %25 = arith.maximumf %23, %24 : vector<8x48xf32>
    %c0_21 = arith.constant 0 : index
    %c0_22 = arith.constant 0 : index
    %26 = vector.load %arg2[%c0_21, %c0_22] : memref<8x16xf32, #tpu.memory_space<vmem>>, vector<8x16xf32>
    %c128 = arith.constant 128 : index
    %c0_23 = arith.constant 0 : index
    %27 = vector.load %arg5[%c128, %c0_23] : memref<320x128xf32, #tpu.memory_space<vmem>>, vector<32x64xf32>
    %cst_24 = arith.constant dense<0.000000e+00> : vector<8x64xf32>
    %28 = tpu.matmul %7, %27, %cst_24 {dimension_numbers = #tpu.dot_dimension_numbers<[1], [0], [0], [1], [0, 0, 1, 1], [], []>} : vector<8x32xf32>, vector<32x64xf32>, vector<8x64xf32> -> vector<8x64xf32>
    %c160 = arith.constant 160 : index
    %c0_25 = arith.constant 0 : index
    %29 = vector.load %arg5[%c160, %c0_25] : memref<320x128xf32, #tpu.memory_space<vmem>>, vector<32x64xf32>
    %cst_26 = arith.constant dense<0.000000e+00> : vector<8x64xf32>
    %30 = tpu.matmul %15, %29, %cst_26 {dimension_numbers = #tpu.dot_dimension_numbers<[1], [0], [0], [1], [0, 0, 1, 1], [], []>} : vector<8x32xf32>, vector<32x64xf32>, vector<8x64xf32> -> vector<8x64xf32>
    %31 = arith.addf %28, %30 : vector<8x64xf32>
    %c192 = arith.constant 192 : index
    %c0_27 = arith.constant 0 : index
    %32 = vector.load %arg5[%c192, %c0_27] : memref<320x128xf32, #tpu.memory_space<vmem>>, vector<16x64xf32>
    %cst_28 = arith.constant dense<0.000000e+00> : vector<8x64xf32>
    %33 = tpu.matmul %26, %32, %cst_28 {dimension_numbers = #tpu.dot_dimension_numbers<[1], [0], [0], [1], [0, 0, 1, 1], [], []>} : vector<8x16xf32>, vector<16x64xf32>, vector<8x64xf32> -> vector<8x64xf32>
    %34 = arith.addf %31, %33 : vector<8x64xf32>
    %c208 = arith.constant 208 : index
    %c0_29 = arith.constant 0 : index
    %35 = vector.load %arg5[%c208, %c0_29] : memref<320x128xf32, #tpu.memory_space<vmem>>, vector<48x64xf32>
    %cst_30 = arith.constant dense<0.000000e+00> : vector<8x64xf32>
    %36 = tpu.matmul %25, %35, %cst_30 {dimension_numbers = #tpu.dot_dimension_numbers<[1], [0], [0], [1], [0, 0, 1, 1], [], []>} : vector<8x48xf32>, vector<48x64xf32>, vector<8x64xf32> -> vector<8x64xf32>
    %37 = arith.addf %34, %36 : vector<8x64xf32>
    %c3 = arith.constant 3 : index
    %c0_31 = arith.constant 0 : index
    %38 = vector.load %arg6[%c3, %c0_31] : memref<16x128xf32, #tpu.memory_space<vmem>>, vector<1x64xf32>
    %39 = vector.broadcast %38 : vector<1x64xf32> to vector<8x64xf32>
    %40 = arith.addf %37, %39 : vector<8x64xf32>
    %c4 = arith.constant 4 : index
    %c0_32 = arith.constant 0 : index
    %41 = vector.load %arg6[%c4, %c0_32] : memref<16x128xf32, #tpu.memory_space<vmem>>, vector<1x64xf32>
    %c5 = arith.constant 5 : index
    %c0_33 = arith.constant 0 : index
    %42 = vector.load %arg6[%c5, %c0_33] : memref<16x128xf32, #tpu.memory_space<vmem>>, vector<1x64xf32>
    %cst_34 = arith.constant dense<0.000000e+00> : vector<8xf32>
    %43 = vector.multi_reduction <add>, %40, %cst_34 [1] : vector<8x64xf32> to vector<8xf32>
    %44 = vector.shape_cast %43 : vector<8xf32> to vector<8x1xf32>
    %cst_35 = arith.constant 6.400000e+01 : f32
    %45 = vector.broadcast %cst_35 : f32 to vector<8x1xf32>
    %46 = arith.divf %44, %45 : vector<8x1xf32>
    %47 = vector.broadcast %46 : vector<8x1xf32> to vector<8x64xf32>
    %48 = arith.subf %40, %47 : vector<8x64xf32>
    %49 = arith.mulf %48, %48 : vector<8x64xf32>
    %cst_36 = arith.constant dense<0.000000e+00> : vector<8xf32>
    %50 = vector.multi_reduction <add>, %49, %cst_36 [1] : vector<8x64xf32> to vector<8xf32>
    %51 = vector.shape_cast %50 : vector<8xf32> to vector<8x1xf32>
    %cst_37 = arith.constant 6.400000e+01 : f32
    %52 = vector.broadcast %cst_37 : f32 to vector<8x1xf32>
    %53 = arith.divf %51, %52 : vector<8x1xf32>
    %cst_38 = arith.constant 9.99999974E-6 : f32
    %54 = vector.broadcast %cst_38 : f32 to vector<8x1xf32>
    %55 = arith.addf %53, %54 : vector<8x1xf32>
    %56 = math.rsqrt %55 : vector<8x1xf32>
    %57 = vector.broadcast %56 : vector<8x1xf32> to vector<8x64xf32>
    %58 = arith.mulf %48, %57 : vector<8x64xf32>
    %59 = vector.broadcast %41 : vector<1x64xf32> to vector<8x64xf32>
    %60 = arith.mulf %58, %59 : vector<8x64xf32>
    %61 = vector.broadcast %42 : vector<1x64xf32> to vector<8x64xf32>
    %62 = arith.addf %60, %61 : vector<8x64xf32>
    %cst_39 = arith.constant 0.000000e+00 : f32
    %63 = vector.broadcast %cst_39 : f32 to vector<8x64xf32>
    %64 = arith.maximumf %62, %63 : vector<8x64xf32>
    %c256 = arith.constant 256 : index
    %c0_40 = arith.constant 0 : index
    %65 = vector.load %arg5[%c256, %c0_40] : memref<320x128xf32, #tpu.memory_space<vmem>>, vector<64x32xf32>
    %cst_41 = arith.constant dense<0.000000e+00> : vector<8x32xf32>
    %66 = tpu.matmul %64, %65, %cst_41 {dimension_numbers = #tpu.dot_dimension_numbers<[1], [0], [0], [1], [0, 0, 1, 1], [], []>} : vector<8x64xf32>, vector<64x32xf32>, vector<8x32xf32> -> vector<8x32xf32>
    %c6 = arith.constant 6 : index
    %c0_42 = arith.constant 0 : index
    %67 = vector.load %arg6[%c6, %c0_42] : memref<16x128xf32, #tpu.memory_space<vmem>>, vector<1x32xf32>
    %68 = vector.broadcast %67 : vector<1x32xf32> to vector<8x32xf32>
    %69 = arith.addf %66, %68 : vector<8x32xf32>
    %c7 = arith.constant 7 : index
    %c0_43 = arith.constant 0 : index
    %70 = vector.load %arg6[%c7, %c0_43] : memref<16x128xf32, #tpu.memory_space<vmem>>, vector<1x32xf32>
    %c8 = arith.constant 8 : index
    %c0_44 = arith.constant 0 : index
    %71 = vector.load %arg6[%c8, %c0_44] : memref<16x128xf32, #tpu.memory_space<vmem>>, vector<1x32xf32>
    %cst_45 = arith.constant dense<0.000000e+00> : vector<8xf32>
    %72 = vector.multi_reduction <add>, %69, %cst_45 [1] : vector<8x32xf32> to vector<8xf32>
    %73 = vector.shape_cast %72 : vector<8xf32> to vector<8x1xf32>
    %cst_46 = arith.constant 3.200000e+01 : f32
    %74 = vector.broadcast %cst_46 : f32 to vector<8x1xf32>
    %75 = arith.divf %73, %74 : vector<8x1xf32>
    %76 = vector.broadcast %75 : vector<8x1xf32> to vector<8x32xf32>
    %77 = arith.subf %69, %76 : vector<8x32xf32>
    %78 = arith.mulf %77, %77 : vector<8x32xf32>
    %cst_47 = arith.constant dense<0.000000e+00> : vector<8xf32>
    %79 = vector.multi_reduction <add>, %78, %cst_47 [1] : vector<8x32xf32> to vector<8xf32>
    %80 = vector.shape_cast %79 : vector<8xf32> to vector<8x1xf32>
    %cst_48 = arith.constant 3.200000e+01 : f32
    %81 = vector.broadcast %cst_48 : f32 to vector<8x1xf32>
    %82 = arith.divf %80, %81 : vector<8x1xf32>
    %cst_49 = arith.constant 9.99999974E-6 : f32
    %83 = vector.broadcast %cst_49 : f32 to vector<8x1xf32>
    %84 = arith.addf %82, %83 : vector<8x1xf32>
    %85 = math.rsqrt %84 : vector<8x1xf32>
    %86 = vector.broadcast %85 : vector<8x1xf32> to vector<8x32xf32>
    %87 = arith.mulf %77, %86 : vector<8x32xf32>
    %88 = vector.broadcast %70 : vector<1x32xf32> to vector<8x32xf32>
    %89 = arith.mulf %87, %88 : vector<8x32xf32>
    %90 = vector.broadcast %71 : vector<1x32xf32> to vector<8x32xf32>
    %91 = arith.addf %89, %90 : vector<8x32xf32>
    %cst_50 = arith.constant 0.000000e+00 : f32
    %92 = vector.broadcast %cst_50 : f32 to vector<8x32xf32>
    %93 = arith.maximumf %91, %92 : vector<8x32xf32>
    %c9 = arith.constant 9 : index
    %c0_51 = arith.constant 0 : index
    %94 = vector.load %arg6[%c9, %c0_51] : memref<16x128xf32, #tpu.memory_space<vmem>>, vector<1x32xf32>
    %95 = vector.broadcast %94 : vector<1x32xf32> to vector<8x32xf32>
    %96 = arith.mulf %93, %95 : vector<8x32xf32>
    %cst_52 = arith.constant dense<0.000000e+00> : vector<8xf32>
    %97 = vector.multi_reduction <add>, %96, %cst_52 [1] : vector<8x32xf32> to vector<8xf32>
    %98 = vector.shape_cast %97 : vector<8xf32> to vector<8x1xf32>
    %c10 = arith.constant 10 : index
    %c0_53 = arith.constant 0 : index
    %99 = vector.load %arg6[%c10, %c0_53] : memref<16x128xf32, #tpu.memory_space<vmem>>, vector<1x1xf32>
    %100 = vector.broadcast %99 : vector<1x1xf32> to vector<8x1xf32>
    %101 = arith.addf %98, %100 : vector<8x1xf32>
    %102 = arith.negf %101 : vector<8x1xf32>
    %103 = math.exp %102 : vector<8x1xf32>
    %cst_54 = arith.constant 1.000000e+00 : f32
    %104 = vector.broadcast %cst_54 : f32 to vector<8x1xf32>
    %105 = arith.addf %104, %103 : vector<8x1xf32>
    %106 = arith.divf %104, %105 : vector<8x1xf32>
    %107 = vector.shape_cast %106 : vector<8x1xf32> to vector<8x1xf32>
    %108 = vector.broadcast %107 : vector<8x1xf32> to vector<8x128xf32>
    %c0_55 = arith.constant 0 : index
    %c0_56 = arith.constant 0 : index
    %109 = vector.load %arg7[%c0_55, %c0_56] : memref<8x128xf32, #tpu.memory_space<vmem>>, vector<8x128xf32>
    tpu.vector_store %arg7[%c0_55, %c0_56], %108 {strides = array<i32>} : memref<8x128xf32, #tpu.memory_space<vmem>>, vector<8x128xf32>,
    return
  }
}

</mosaic_0001>

<bundles_post_ra>
// kernel: forward.1
= control target key start
LH: loop header
LB: loop body
LE: loop exit
PB: predicated region body
PF: predicated region fallthrough
CT: control target
= control target key end

     0   :  { %12 = vsyncpa [#allocation3], 0  ;;  %s1161_s24 = smov [#allocation2]   ;;  %s1331_s0 = inlined_call_operand.vmem [shape: f32[8,40], index: 0, kind: input, shape index: {}]   ;;  %s1332_s1 = inlined_call_operand.vmem [shape: f32[8,64], index: 1, kind: input, shape index: {}]   ;;  %s1333_s2 = inlined_call_operand.vmem [shape: f32[8,16], index: 2, kind: input, shape index: {}]   ;;  %s1334_s3 = inlined_call_operand.vmem [shape: f32[32,24], index: 3, kind: input, shape index: {}]   ;;  %s1335_s4 = inlined_call_operand.vmem [shape: f32[8,32], index: 4, kind: input, shape index: {}]   ;;  %s1336_s5 = inlined_call_operand.hbm [shape: f32[320,128], index: 5, kind: input, shape index: {}]   ;;  %s1337_s6 = inlined_call_operand.vmem [shape: f32[16,128], index: 6, kind: input, shape index: {}]   ;;  %s1338_s7 = inlined_call_operand.vmem [shape: f32[8,128], index: 7, kind: output, shape index: {}]  }
   0x1   :  { %s28_s25 = sshll.u32 %s1161_s24, 4  ;;  %s1137_s28 = scalar_lea.hbm %s1336_s5, 5120  ;;  %s29_s25 = int_to_ptr.vmem [resolvable:$true] %s28_s25 }
   0x2   :  { %p1138_p0 = scmp.ne.s32.totalorder %s1336_s5, %s1137_s28  ;;  %p1141_p1 = scmp.lt.u32.totalorder %s1137_s28, %s1336_s5 }
   0x4   :  { %p1143_p2 = pnand %p1141_p1, %p1138_p0 }
   0x6   :  { %1146 = shalt.err (!%p1143_p2)
}
   0x7   :  { %s1147_s10 = scalar_lea.vmem %s29_s25, 5120  ;;  %p1152_p4 = scmp.lt.s32.totalorder %s29_s25, %s29_s25 }
   0x8   :  { %p1148_p3 = scmp.ne.s32.totalorder %s29_s25, %s1147_s10  ;;  %p1153_p5 = scmp.lt.s32.totalorder %s1147_s10, %s1147_s10 }
   0xa   :  { %p1154_p6 = por %p1153_p5, %p1152_p4 }
   0xc   :  { %p1155_p7 = pnand %p1154_p6, %p1148_p3 }
   0xe   :  { %1158 = shalt.err (!%p1155_p7)
}
   0xf   :  { %s1162_s11 = smov 128   ;;  %s1163_s12 = smov 8  }
  0x10   :  { %34 = dma.hbm_to_vmem [thread:$0]  %s1336_s5, 5120, %s29_s25, [#allocation3], %s1162_s11, %s1162_s11, %s1163_s12  }
  0x11   :  { %1159 = dma.done.wait [#allocation3], 5120  }
  0x12   :  { %1160 = vsyncadd [#allocation3], 4294962176  ;;  %v1164_v0 = vmov 0.0|0.0   ;;  %vm1165_vm0 = vmmov 0   ;;  %v1166_v1 = vmov 0.0   ;;  %v41_v2 = vld [vmem:[#allocation2] sm:$0xff] }
  0x13   :  { %1057 = vmatprep.subr.bf16.mxu0 %v1164_v0  ;;  %1063 = vmatprep.subr.bf16.mxu1 %v1164_v0  ;;  %v42_v3 = vld [vmem:[#allocation2 + $0x8] sm:$0xff]  ;;  %v128_v6 = vld [vmem:[#allocation2 + $0x30] sm:$0xff]  ;;  %v44_v8 = vld [vmem:[#allocation2 + $0x18] sm:$0xff]  ;;  %vm51_vm1 = vcmask 326656   ;;  %vm220_vm2 = vcmask 261120   ;;  %vm140_vm3 = vcmask 523264  }
  0x14   :  { %952 = vmatprep.mubr.msk.f32.mxu0 %vm1165_vm0, %v1166_v1  ;;  %971 = vmatprep.mubr.msk.f32.mxu1 %vm1165_vm0, %v1166_v1  ;;  %v127_v4 = vld [vmem:[#allocation2 + $0x28] sm:$0xff]  ;;  %v1058_v5 = vpack.c.bf16 %v42_v3, %v41_v2  ;;  %v43_v7 = vld [vmem:[#allocation2 + $0x10] sm:$0xff]  ;;  %v129_v10 = vld [vmem:[#allocation2 + $0x38] sm:$0xff]  ;;  %vm302_vm4 = vcmask 195584   ;;  %vm534_vm5 = vcmask 130048   ;;  %vm615_vm6 = vcmask 392192  }
  0x15   :  { %v1064_v9 = vpack.c.bf16 %v128_v6, %v127_v4  ;;  %v130_v11 = vld [vmem:[#allocation2 + $0x40] sm:$0xff]  ;;  %v1061_v12 = vpack.c.bf16 %v44_v8, %v43_v7  ;;  %v217_v15 = vld [vmem:[%s1334_s3 + $0x8] sm:$0xff]  ;;  %v132_v17 = vld [vmem:[#allocation2 + $0x50] sm:$0xff] }
  0x16   :  { %1059 = vmatpush3.bf16.msra.mxu0 %v1058_v5  ;;  %v1067_v13 = vpack.c.bf16 %v130_v11, %v129_v10  ;;  %v216_v14 = vld [vmem:[%s1334_s3] sm:$0xff]  ;;  %v131_v16 = vld [vmem:[#allocation2 + $0x48] sm:$0xff]  ;;  %v218_v22 = vld [vmem:[%s1334_s3 + $0x10] sm:$0xff] }
  0x17   :  { %1060 = vmatprep.subr.bf16.mxu0 %v1164_v0  ;;  %1065 = vmatpush3.bf16.msra.mxu1 %v1064_v9  ;;  %v45_v18 = vld [vmem:[#allocation2 + $0x20] sm:$0xff]  ;;  %v1076_v20 = vpack.c.bf16 %v217_v15, %v216_v14  ;;  %v1070_v21 = vpack.c.bf16 %v132_v17, %v131_v16  ;;  %v219_v23 = vld [vmem:[%s1334_s3 + $0x18] sm:$0xff]  ;;  %v294_v30 = vld [vmem:[#allocation2 + $0x68] sm:$0xff] }
  0x18   :  { %1066 = vmatprep.subr.bf16.mxu1 %v1164_v0  ;;  %v40_v19 = vld [vmem:[%s1331_s0] sm:$0xff]  ;;  %v133_v24 = vld [vmem:[#allocation2 + $0x58] sm:$0xff]  ;;  %v1079_v26 = vpack.c.bf16 %v219_v23, %v218_v22  ;;  %v295_v31 = vld [vmem:[#allocation2 + $0x70] sm:$0xff] }
  0x19   :  { %v134_v25 = vld [vmem:[#allocation2 + $0x60] sm:$0xff]  ;;  %v1082_v32 = vpack.c.bf16 %v295_v31, %v294_v30  ;;  %v383_v34 = vld [vmem:[#allocation2 + $0xa8] sm:$0xff]  ;;  %v296_v35 = vld [vmem:[#allocation2 + $0x78] sm:$0xff] }
  0x1a   :  { %1062 = vmatpush3.bf16.msra.mxu0 %v1061_v12  ;;  %v1073_v27 = vpack.c.bf16 %v134_v25, %v133_v24  ;;  %v215_v28 = vld [vmem:[%s1335_s4] sm:$0xff]  ;;  %v384_v37 = vld [vmem:[#allocation2 + $0xb0] sm:$0xff]  ;;  %v385_v38 = vld [vmem:[#allocation2 + $0xb8] sm:$0xff] }
  0x1b   :  { %950 = vmatprep.subr.mxu0 %v1166_v1  ;;  %1068 = vmatpush3.bf16.msra.mxu1 %v1067_v13  ;;  %v126_v29 = vld [vmem:[%s1332_s1] sm:$0xff]  ;;  %v1088_v39 = vpack.c.bf16 %v385_v38, %v384_v37  ;;  %v379_v43 = vld [vmem:[#allocation2 + $0x88] sm:$0xff]  ;;  %v380_v46 = vld [vmem:[#allocation2 + $0x90] sm:$0xff] }
  0x1c   :  { %1069 = vmatprep.subr.bf16.mxu1 %v1164_v0  ;;  %v382_v33 = vld [vmem:[#allocation2 + $0xa0] sm:$0xff]  ;;  %v381_v47 = vld [vmem:[#allocation2 + $0x98] sm:$0xff]  ;;  %v533_v49 = vld [vmem:[#allocation2 + $0xc8] sm:$0xff] }
  0x1d   :  { %v1085_v36 = vpack.c.bf16 %v383_v34, %v382_v33  ;;  %v378_v42 = vld [vmem:[#allocation2 + $0x80] sm:$0xff]  ;;  %v1094_v56 = vpack.c.bf16 %v381_v47, %v380_v46  ;;  %v609_v60 = vld [vmem:[#allocation2 + $0xd0] sm:$0xff]  ;;  %v610_v61 = vld [vmem:[#allocation2 + $0xd8] sm:$0xff] }
  0x1e   :  { %951 = vmatpush3.msra.mxu0 %v45_v18  ;;  %v870_v44 = vld [vmem:[%s1337_s6 + $0x1] ss:$0 sm:$0xff]  ;;  %v1091_v45 = vpack.c.bf16 %v379_v43, %v378_v42  ;;  %v868_v50 = vld [vmem:[%s1337_s6] ss:$0 sm:$0xff]  ;;  %v1100_v63 = vpack.c.bf16 %v610_v61, %v609_v60  ;;  %v612_v4 = vld [vmem:[#allocation2 + $0xe8] sm:$0xff] }
  0x1f   :  { %953 = vmatmul.mubr.msk.f32.vlgmr.msra.gmra.mrb[0].mxu0 %vm51_vm1, %v40_v19  ;;  %1075 = vmatprep.subr.bf16.mxu0 %v1164_v0  ;;  %v532_v48 = vld [vmem:[#allocation2 + $0xc0] sm:$0xff]  ;;  %v613_v6 = vld [vmem:[#allocation2 + $0xf0] sm:$0xff]  ;;  %v614_v7 = vld [vmem:[#allocation2 + $0xf8] sm:$0xff] }
  0x20   :  { %1077 = vmatpush3.bf16.msra.mxu0 %v1076_v20  ;;  %1071 = vmatpush3.bf16.msra.mxu1 %v1070_v21  ;;  %v1097_v57 = vpack.c.bf16 %v533_v49, %v532_v48  ;;  %v377_v62 = vld [vmem:[%s1333_s2] sm:$0xff]  ;;  %v1106_v8 = vpack.c.bf16 %v614_v7, %v613_v6  ;;  %v724_v33 = vld [vmem:[#allocation2 + $0x108] sm:$0xff]  ;;  %v730_v42 = vld [vmem:[#allocation2 + $0x138] sm:$0xff] }
  0x21   :  { %1078 = vmatprep.subr.bf16.mxu0 %v1164_v0  ;;  %1072 = vmatprep.subr.bf16.mxu1 %v1164_v0  ;;  %v611_v3 = vld [vmem:[#allocation2 + $0xe0] sm:$0xff]  ;;  %v885_v7 = vld [vmem:[%s1337_s6 + $0x8] ss:$0 sm:$0xff] }
  0x22   :  { %982 = vmatprep.mubr.msk.f32.mxu0 %vm1165_vm0, %v1166_v1  ;;  %v1103_v5 = vpack.c.bf16 %v612_v4, %v611_v3  ;;  %v873_v9 = vld [vmem:[%s1337_s6 + $0x2] ss:$0 sm:$0xff]  ;;  %v879_v22 = vld [vmem:[%s1337_s6 + $0x3] ss:$0 sm:$0xff]  ;;  %v880_v48 = vld [vmem:[%s1337_s6 + $0x4] ss:$0 sm:$0xff] }
  0x23   :  { %v727_v38 = vld [vmem:[#allocation2 + $0x120] sm:$0xff] }
  0x24   :  { %1080 = vmatpush3.bf16.msra.mxu0 %v1079_v26  ;;  %1074 = vmatpush3.bf16.msra.mxu1 %v1073_v27 }
  0x25   :  { %1081 = vmatprep.subr.bf16.mxu1 %v1164_v0  ;;  %1084 = vmatprep.subr.bf16.mxu0 %v1164_v0 }
  0x27   :  { %983 = vmatmul.mubr.msk.f32.vlgmr.msra.gmra.mrb[2].mxu0 %vm220_vm2, %v215_v28  ;;  %972 = vmatmul.mubr.msk.f32.vlgmr.msra.gmra.mrb[0].mxu1 %vm140_vm3, %v126_v29 }
  0x28   :  { %991 = vmatprep.mubr.msk.f32.mxu1 %vm1165_vm0, %v1166_v1  ;;  %1002 = vmatprep.mubr.msk.f32.mxu0 %vm1165_vm0, %v1166_v1 }
  0x29   :  { %1083 = vmatpush3.bf16.msra.mxu1 %v1082_v32  ;;  %1086 = vmatpush3.bf16.msra.mxu0 %v1085_v36  ;;  %v723_v32 = vld [vmem:[#allocation2 + $0x100] sm:$0xff]  ;;  %v726_v36 = vld [vmem:[#allocation2 + $0x118] sm:$0xff] }
  0x2a   :  { %989 = vmatprep.subr.mxu1 %v1166_v1  ;;  %1087 = vmatprep.subr.bf16.mxu0 %v1164_v0  ;;  %v1109_v34 = vpack.c.bf16 %v724_v33, %v723_v32 }
  0x2d   :  { %990 = vmatpush3.msra.mxu1 %v296_v35  ;;  %1089 = vmatpush3.bf16.msra.mxu0 %v1088_v39  ;;  %v725_v35 = vld [vmem:[#allocation2 + $0x110] sm:$0xff]  ;;  %v728_v39 = vld [vmem:[#allocation2 + $0x128] sm:$0xff] }
  0x2e   :  { %1090 = vmatprep.subr.bf16.mxu1 %v1164_v0  ;;  %1096 = vmatprep.subr.bf16.mxu0 %v1164_v0  ;;  %v1112_v37 = vpack.c.bf16 %v726_v36, %v725_v35 }
  0xf2   :  { %v121_v40 = vpop.f32.mrb[0].mxu0 }
  0xf3   :  { %v954_v41 = vpop.f32.mrb[1].mxu0  ;;  %v122_v58 = vadd.f32 %v868_v50, %v121_v40  ;;  %v1115_v40 = vpack.c.bf16 %v728_v39, %v727_v38  ;;  %v881_v50 = vld [vmem:[%s1337_s6 + $0x5] ss:$0 sm:$0xff] }
  0xf4   :  { %v729_v41 = vld [vmem:[#allocation2 + $0x130] sm:$0xff] }
  0xf5   :  { %v125_v2 = vmax.f32 %v122_v58, 0.0  ;;  %v1118_v43 = vpack.c.bf16 %v730_v42, %v729_v41 }
  0xfa   :  { %v290_v51 = vpop.f32.mrb[2].mxu0  ;;  %v210_v52 = vpop.f32.mrb[0].mxu1 }
  0xfb   :  { %v211_v53 = vadd.f32 %v870_v44, %v210_v52  ;;  %v984_v54 = vpop.f32.mrb[3].mxu0  ;;  %992 = vmatmul.mubr.msk.f32.vlgmr.msra.gmra.mrb[2].mxu1 %vm302_vm4, %v290_v51  ;;  %v973_v55 = vpop.f32.mrb[1].mxu1 }
  0xfc   :  { %1092 = vmatpush3.bf16.msra.mxu1 %v1091_v45  ;;  %1013 = vmatprep.mubr.msk.f32.mxu1 %vm1165_vm0, %v1166_v1 }
  0xfd   :  { %v214_v59 = vmax.f32 %v211_v53, 0.0  ;;  %1093 = vmatprep.subr.bf16.mxu1 %v1164_v0 }
  0xff   :  { %1003 = vmatmul.mubr.msk.f32.vlgmr.msra.gmra.mrb[4].mxu0 %vm220_vm2, %v214_v59 }
 0x100   :  { %1095 = vmatpush3.bf16.msra.mxu1 %v1094_v56  ;;  %1098 = vmatpush3.bf16.msra.mxu0 %v1097_v57 }
 0x101   :  { %1020 = vmatprep.mubr.msk.f32.mxu0 %vm1165_vm0, %v1166_v1  ;;  %1099 = vmatprep.subr.bf16.mxu0 %v1164_v0 }
 0x102   :  { %1108 = vmatprep.subr.bf16.mxu1 %v1164_v0 }
 0x103   :  { %1014 = vmatmul.mubr.msk.f32.vlgmr.msra.gmra.mrb[4].mxu1 %vm220_vm2, %v125_v2  ;;  %1021 = vmatmul.mubr.msk.f32.vlgmr.msra.gmra.mrb[6].mxu0 %vm534_vm5, %v377_v62 }
 0x104   :  { %1101 = vmatpush3.bf16.msra.mxu0 %v1100_v63  ;;  %1035 = vmatprep.mubr.msk.f32.mxu0 %vm1165_vm0, %v1166_v1 }
 0x105   :  { %1102 = vmatprep.subr.bf16.mxu0 %v1164_v0  ;;  %1054 = vmatprep.mubr.msk.f32.mxu1 %vm1165_vm0, %v1166_v1 }
 0x106   :  { %1110 = vmatpush3.bf16.msra.mxu1 %v1109_v34 }
 0x107   :  { %1111 = vmatprep.subr.bf16.mxu1 %v1164_v0 }
 0x108   :  { %1104 = vmatpush3.bf16.msra.mxu0 %v1103_v5  ;;  %v884_v5 = vld [vmem:[%s1337_s6 + $0x7] ss:$0 sm:$0xff] }
 0x109   :  { %1105 = vmatprep.subr.bf16.mxu0 %v1164_v0 }
 0x10a   :  { %1113 = vmatpush3.bf16.msra.mxu1 %v1112_v37 }
 0x10b   :  { %1114 = vmatprep.subr.bf16.mxu1 %v1164_v0 }
 0x10c   :  { %1107 = vmatpush3.bf16.msra.mxu0 %v1106_v8 }
 0x10e   :  { %1116 = vmatpush3.bf16.msra.mxu1 %v1115_v40 }
 0x10f   :  { %1117 = vmatprep.subr.bf16.mxu1 %v1164_v0  ;;  %v882_v0 = vld [vmem:[%s1337_s6 + $0x6] ss:$0 sm:$0xff] }
 0x112   :  { %1119 = vmatpush3.bf16.msra.mxu1 %v1118_v43 }
 0x1ce   :  { %v372_v10 = vpop.f32.mrb[2].mxu1 }
 0x1cf   :  { %v373_v11 = vadd.f32 %v873_v9, %v372_v10  ;;  %v993_v12 = vpop.f32.mrb[3].mxu1  ;;  %v886_v10 = vld [vmem:[%s1337_s6 + $0x9] ss:$0 sm:$0xff] }
 0x1d1   :  { %v376_v13 = vmax.f32 %v373_v11, 0.0 }
 0x1d2   :  { %v455_v14 = vpop.f32.mrb[4].mxu0 }
 0x1d3   :  { %1036 = vmatmul.mubr.msk.f32.vlgmr.msra.gmra.mrb[8].mxu0 %vm615_vm6, %v376_v13  ;;  %v1004_v15 = vpop.f32.mrb[5].mxu0 }
 0x1d4   :  { %v887_v15 = vld [vmem:[%s1337_s6 + $0xa] ss:$0 sm:$0xff] }
 0x1d6   :  { %v528_v1 = vpop.f32.mrb[4].mxu1  ;;  %v604_v16 = vpop.f32.mrb[6].mxu0 }
 0x1d7   :  { %v529_v17 = vadd.f32 %v528_v1, %v455_v14  ;;  %v1015_v18 = vpop.f32.mrb[5].mxu1  ;;  %v1022_v19 = vpop.f32.mrb[7].mxu0  ;;  %v1167_v14 = vmov 0  }
 0x1d8   :  { %1127 = vset.pattern.permute.xlu1 %v1167_v14  ;;  %1128 = vset.pattern.permute.xlu0 %v1167_v14 }
 0x1d9   :  { %v608_v20 = vadd.f32 %v604_v16, %v529_v17 }
 0x2a6   :  { %v685_v21 = vpop.f32.mrb[8].mxu0 }
 0x2a7   :  { %v689_v23 = vadd.f32 %v685_v21, %v608_v20  ;;  %v1037_v24 = vpop.f32.mrb[9].mxu0 }
 0x2a9   :  { %v695_v25 = vadd.f32 %v879_v22, %v689_v23 }
 0x2ab   :  { %v698_v26 = vsel %vm140_vm3, %v695_v25, 0.0 }
 0x2ac   :  { %699 = vadd.xlane.f32.xlu0 %v698_v26 }
 0x339   :  { %v700_v27 = vpop.xlane.xlu0 %699 }
 0x33a   :  { %v702_v28 = vmul.f32 0.015625, %v700_v27 }
 0x33c   :  { %v703_v29 = vsub.f32 %v695_v25, %v702_v28 }
 0x33e   :  { %v704_v30 = vmul.f32 %v703_v29, %v703_v29 }
 0x340   :  { %v705_v31 = vsel %vm140_vm3, %v704_v30, 0.0 }
 0x341   :  { %706 = vadd.xlane.f32.xlu0 %v705_v31 }
 0x3ce   :  { %v707_v44 = vpop.xlane.xlu0 %706 }
 0x3cf   :  { %v708_v45 = vmul.f32 0.015625, %v707_v44 }
 0x3d1   :  { %v709_v46 = vadd.f32 1e-05, %v708_v45 }
 0x3d3   :  { %1129 = vrsqrt.f32 %v709_v46 }
 0x3dd   :  { %v1130_v47 = vpop.eup %1129 }
 0x3de   :  { %v711_v49 = vmul.f32 %v1130_v47, %v703_v29 }
 0x3e0   :  { %v716_v51 = vmul.f32 %v880_v48, %v711_v49 }
 0x3e2   :  { %v721_v52 = vadd.f32 %v881_v50, %v716_v51 }
 0x3e4   :  { %v722_v53 = vmax.f32 %v721_v52, 0.0 }
 0x3e6   :  { %1055 = vmatmul.mubr.msk.f32.vlgmr.msra.gmra.mrb[6].mxu1 %vm140_vm3, %v722_v53 }
 0x4b9   :  { %v805_v54 = vpop.f32.mrb[6].mxu1 }
 0x4ba   :  { %v806_v55 = vadd.f32 %v882_v0, %v805_v54  ;;  %v1056_v56 = vpop.f32.mrb[7].mxu1 }
 0x4bc   :  { %v811_v57 = vsel %vm220_vm2, %v806_v55, 0.0 }
 0x4bd   :  { %812 = vadd.xlane.f32.xlu1 %v811_v57 }
 0x54a   :  { %v813_v58 = vpop.xlane.xlu1 %812 }
 0x54b   :  { %v815_v59 = vmul.f32 0.03125, %v813_v58 }
 0x54d   :  { %v816_v60 = vsub.f32 %v806_v55, %v815_v59 }
 0x54f   :  { %v817_v61 = vmul.f32 %v816_v60, %v816_v60 }
 0x551   :  { %v818_v62 = vsel %vm220_vm2, %v817_v61, 0.0 }
 0x552   :  { %819 = vadd.xlane.f32.xlu1 %v818_v62 }
 0x5df   :  { %v820_v63 = vpop.xlane.xlu1 %819 }
 0x5e0   :  { %v821_v2 = vmul.f32 0.03125, %v820_v63 }
 0x5e2   :  { %v822_v3 = vadd.f32 1e-05, %v821_v2 }
 0x5e4   :  { %1131 = vrsqrt.f32 %v822_v3 }
 0x5ee   :  { %v1132_v4 = vpop.eup %1131 }
 0x5ef   :  { %v824_v6 = vmul.f32 %v1132_v4, %v816_v60 }
 0x5f1   :  { %v829_v8 = vmul.f32 %v884_v5, %v824_v6 }
 0x5f3   :  { %v834_v9 = vadd.f32 %v885_v7, %v829_v8 }
 0x5f5   :  { %v835_v11 = vmax.f32 %v834_v9, 0.0 }
 0x5f7   :  { %v841_v12 = vmul.f32 %v886_v10, %v835_v11 }
 0x5f9   :  { %v842_v13 = vsel %vm220_vm2, %v841_v12, 0.0 }
 0x5fa   :  { %843 = vadd.xlane.f32.xlu0 %v842_v13 }
 0x687   :  { %v844_v1 = vpop.xlane.xlu0 %843 }
 0x688   :  { %v850_v16 = vadd.f32 %v887_v15, %v844_v1 }
 0x68a   :  { %v888_v17 = vmul.f32 -1.442695, %v850_v16 }
 0x68c   :  { %1133 = vpow2.f32 %v888_v17 }
 0x696   :  { %v1134_v18 = vpop.eup %1133 }
 0x697   :  { %v854_v19 = vadd.f32 1.0, %v1134_v18 }
 0x699   :  { %1135 = vrcp.f32 %v854_v19 }
 0x6a3   :  { %v1136_v20 = vpop.eup %1135 }
 0x6a4   :  { %859 = vperm.xlu1 %1127, %v1136_v20  }
 0x723   :  { %v860_v21 = vpop.permute.xlu1 %859 }
 0x724   :  { %862 = vst [vmem:[%s1338_s7] sm:$0xff] %v860_v21 }
 0x725   :  { %867 = vsyncpa [#allocation3], 1 }

</bundles_post_ra>
